<compile_context>
chip_gen: v6e
topology: v6e:2x2x1
jax: 0.10.0
libtpu: 0.0.40
codegen_flags: <defaults>
</compile_context>

<pallas_src>
import functools

import numpy as np
import jax
import jax.numpy as jnp
from jax import lax
from jax.experimental import pallas as pl
from jax.experimental.pallas import tpu as pltpu

LANE = 128          # class / feature padding granularity (lane-dense)
MAX_ROW_TILE = 256  # row tile for large batches (full MXU depth on v6e/v7x)


def _round_up(x, m):
    return ((x + m - 1) // m) * m


# ----------------------------------------------------------------------------
# The single fused kernel
# ----------------------------------------------------------------------------

def _mixmatch_kernel(x_ref, u_ref, w_ref, b_ref,
                     xlog_ref, ulog_ref, qb_ref, *, num_classes, k):
    """Per row tile:
         x_logits      = x @ W + b                       (labeled rows)
         u_logits[kk]  = u[kk] @ W + b                   (== model(mixed u rows): mix is identity)
         qb            = mean_kk softmax(u_logits[kk])   (softmax masked to num_classes lanes)
       W and b have constant block indices, so they are DMA'd once and stay resident.
    """
    w = w_ref[...]
    b = b_ref[...]

    # Labeled rows.
    xlog_ref[...] = jnp.dot(x_ref[...], w, preferred_element_type=jnp.float32) + b

    # Unlabeled rows: logits + masked softmax + running mean over the K augmentations.
    lane = lax.broadcasted_iota(jnp.int32, xlog_ref.shape, 1)
    prob_sum = jnp.zeros(qb_ref.shape, jnp.float32)
    for kk in range(k):                                       # static unroll, K is tiny
        logits = jnp.dot(u_ref[kk], w, preferred_element_type=jnp.float32) + b
        ulog_ref[kk] = logits
        masked = jnp.where(lane < num_classes, logits, jnp.float32(-1e30))
        m = jnp.max(masked, axis=-1, keepdims=True)
        e = jnp.exp(masked - m)
        prob_sum = prob_sum + e * pl.reciprocal(
            jnp.sum(e, axis=-1, keepdims=True), approx=True)
    qb_ref[...] = prob_sum * jnp.float32(1.0 / k)


def mixmatch_fused(x_flat_bf16, u_stacked_bf16, w_pad_bf16, b_pad_f32, num_classes):
    """x:(B,Dp) bf16, u:(K,B,Dp) bf16, w:(Dp,Cp) bf16, b:(1,Cp) f32
       -> (x_logits (B,Cp) f32, u_logits (K,B,Cp) f32, qb (B,Cp) f32)."""
    bsz, d = x_flat_bf16.shape
    k = u_stacked_bf16.shape[0]
    c = w_pad_bf16.shape[1]
    assert u_stacked_bf16.shape == (k, bsz, d)
    assert c % LANE == 0 and d % LANE == 0

    # Row tiling: one full-batch tile for B<=256; 256-row "parallel" tiles above that
    # (even tile counts keep both v7x TensorCores busy).
    if bsz <= MAX_ROW_TILE:
        tm = bsz
    else:
        tm = MAX_ROW_TILE
        assert bsz % tm == 0, "pad the batch to a multiple of 256 before calling"
    grid = (bsz // tm,)

    # TODO(synk): for very large D (block tiles approaching v7x's 64 MiB VMEM) reintroduce a
    # reduction grid axis with an f32 VMEM accumulator instead of keeping W fully resident.
    kernel = functools.partial(_mixmatch_kernel, num_classes=num_classes, k=k)
    cost = pl.CostEstimate(
        flops=2 * (k + 1) * bsz * d * c,
        transcendentals=k * bsz * c,
        bytes_accessed=(bsz * d * 2 + k * bsz * d * 2          # x, u read once (bf16)
                        + d * c * 2 + c * 4                    # W, b read once
                        + (k + 1) * bsz * c * 4 + bsz * c * 4))  # logits + qb written

    return pl.pallas_call(
        kernel,
        out_shape=(jax.ShapeDtypeStruct((bsz, c), jnp.float32),
                   jax.ShapeDtypeStruct((k, bsz, c), jnp.float32),
                   jax.ShapeDtypeStruct((bsz, c), jnp.float32)),
        grid_spec=pltpu.PrefetchScalarGridSpec(
            num_scalar_prefetch=0,
            grid=grid,
            in_specs=[
                pl.BlockSpec((tm, d), lambda i: (i, 0)),          # x rows
                pl.BlockSpec((k, tm, d), lambda i: (0, i, 0)),    # all K augs of the same rows
                pl.BlockSpec((d, c), lambda i: (0, 0)),           # W resident (read once)
                pl.BlockSpec((1, c), lambda i: (0, 0)),           # bias resident
            ],
            out_specs=[
                pl.BlockSpec((tm, c), lambda i: (i, 0)),          # x_logits
                pl.BlockSpec((k, tm, c), lambda i: (0, i, 0)),    # u_logits
                pl.BlockSpec((tm, c), lambda i: (i, 0)),          # qb
            ],
        ),
        compiler_params=pltpu.CompilerParams(
            dimension_semantics=("parallel",),
            vmem_limit_bytes=32 * 1024 * 1024),
        cost_estimate=cost,
    )(x_flat_bf16, u_stacked_bf16, w_pad_bf16, b_pad_f32)


# ----------------------------------------------------------------------------
# Glue (bookkeeping identical to the torch module)
# ----------------------------------------------------------------------------

class Config:
    def __init__(self, t, k, alpha, batch_size):
        self.t = t            # temperature: present in config, unused by forward (as in torch)
        self.k = k
        self.alpha = alpha
        self.batch_size = batch_size


def interleave_offsets(batch, nu):
    groups = [batch // (nu + 1)] * (nu + 1)
    for x in range(batch - sum(groups)):
        groups[-x - 1] += 1
    offsets = [0]
    for g in groups:
        offsets.append(offsets[-1] + g)
    return offsets


def interleave(xy, batch):
    nu = len(xy) - 1
    offsets = interleave_offsets(batch, nu)
    xy = [[v[offsets[p]:offsets[p + 1]] for p in range(nu + 1)] for v in xy]
    for i in range(1, nu + 1):
        xy[0][i], xy[i][i] = xy[i][i], xy[0][i]
    return [jnp.concatenate(v, axis=0) for v in xy]


def sample_lambda_prime(rng, alpha):
    lam = float(rng.beta(alpha, alpha))     # host-side draw, as in the torch module
    return max(lam, 1.0 - lam)


def mixupalg_forward(x_hat, y_one_hot, ub, model_params, config, lam1, lam2):
    w, bvec = model_params
    bsz, k = config.batch_size, config.k
    num_classes = w.shape[1]
    d = int(np.prod(x_hat.shape[1:]))
    c_pad = _round_up(num_classes, LANE)
    d_pad = _round_up(d, LANE)

    # Lane-dense class axis; pad once, slice at the very end.
    w_pad = jnp.pad(w, ((0, d_pad - d), (0, c_pad - num_classes))).astype(jnp.bfloat16)
    b_pad = jnp.pad(bvec, (0, c_pad - num_classes)).reshape(1, c_pad).astype(jnp.float32)

    # Flatten + cast to the MXU operand dtype exactly once.  No wx/wy concatenation, no
    # qb tiling over the data axis, no separate mixed-slab astype pass.
    def _prep(a):
        a2 = a.reshape(a.shape[0], -1).astype(jnp.bfloat16)
        if d_pad != d:
            a2 = jnp.pad(a2, ((0, 0), (0, d_pad - d)))
        return a2

    x_flat = _prep(x_hat)                                     # (B, Dp) bf16
    u_stacked = jnp.stack([_prep(u) for u in ub], axis=0)     # (K, B, Dp) bf16

    # TODO(synk): the reference builds W without shuffling, so both MixUp operands are the
    # same rows and lam*a + (1-lam)*a == a; the mix-up (and lam1/lam2) has no effect on the
    # outputs and is elided.  Likewise interleave(model(interleave(.))) == model(.) since
    # interleave is an involution and the realized model is row-wise, so one fused kernel
    # covers label guessing and the final model pass (equivalence checked in __main__).
    del lam1, lam2

    x_logits_pad, u_logits_pad, qb_pad = mixmatch_fused(
        x_flat, u_stacked, w_pad, b_pad, num_classes)

    x_logits = x_logits_pad[:, :num_classes]
    u_logits = u_logits_pad.reshape(k * bsz, c_pad)[:, :num_classes]
    x_targets = y_one_hot                                      # identity mix
    qb = qb_pad[:, :num_classes]
    u_targets = jnp.broadcast_to(qb[None], (k, bsz, num_classes)).reshape(
        k * bsz, num_classes)
    return x_logits, x_targets, u_logits, u_targets


# ----------------------------------------------------------------------------
# Literal plain-JAX reference (transcription of the PyTorch forward)
# ----------------------------------------------------------------------------

def _model_ref(x, w, bvec):
    xf = x.reshape(x.shape[0], -1).astype(jnp.bfloat16)
    return jnp.dot(xf, w.astype(jnp.bfloat16), preferred_element_type=jnp.float32) + bvec


def mixupalg_forward_ref(x_hat, y_one_hot, ub, model_params, config, lam1, lam2):
    w, bvec = model_params
    bsz, k = config.batch_size, config.k
    model = lambda x: _model_ref(x, w, bvec)

    qb_init = jnp.stack([model(ub[i]) for i in range(len(ub))], axis=1)     # (B, K, C)
    qb = jax.nn.softmax(qb_init, axis=2).mean(axis=1)                       # (B, C)

    u_hat_data = jnp.concatenate(ub, axis=0)
    u_hat_labels = jnp.concatenate([qb for _ in range(k)], axis=0)
    wx = jnp.concatenate([x_hat.reshape(bsz, -1),
                          u_hat_data.reshape(k * bsz, -1)], axis=0)
    wy = jnp.concatenate([y_one_hot, u_hat_labels], axis=0)

    def mix(lam, a_d, a_l, b_d, b_l):
        return lam * a_d + (1 - lam) * b_d, lam * a_l + (1 - lam) * b_l

    x_prime, p_prime = mix(lam1, x_hat.reshape(bsz, -1), y_one_hot, wx[:bsz], wy[:bsz])
    u_prime, q_prime = mix(lam2, u_hat_data.reshape(k * bsz, -1), u_hat_labels,
                           wx[bsz:], wy[bsz:])

    mixed_inputs = jnp.concatenate([x_prime, u_prime], axis=0)
    mixed_targets = jnp.concatenate([p_prime, q_prime], axis=0)

    chunks = [mixed_inputs[i * bsz:(i + 1) * bsz] for i in range(k + 1)]
    chunks = interleave(chunks, bsz)
    logits = [model(c) for c in chunks]
    logits = interleave(logits, bsz)

    x_logits = logits[0]
    u_logits = jnp.concatenate(logits[1:], axis=0)
    return x_logits, mixed_targets[:bsz], u_logits, mixed_targets[bsz:]


# ----------------------------------------------------------------------------
if __name__ == "__main__":
    config = Config(t=0.5, k=2, alpha=0.75, batch_size=8)

    B, C, H, W = 8, 4, 8, 8
    NUM_CLASSES = 10
    D = C * H * W                                      # 256

    key = jax.random.PRNGKey(0)
    kx, ky, ku, kw = jax.random.split(key, 4)

    x_hat = jax.random.normal(kx, (B, C, H, W), dtype=jnp.float32)
    labels = jax.random.randint(ky, (B,), 0, NUM_CLASSES)
    y_one_hot = jax.nn.one_hot(labels, NUM_CLASSES, dtype=jnp.float32)
    ub = [
        jax.random.normal(jax.random.fold_in(ku, i), (B, C, H, W), dtype=jnp.float32)
        for i in range(config.k)
    ]

    # Deterministic synthetic "model": linear classifier over flattened pixels.
    w_model = jax.random.normal(kw, (D, NUM_CLASSES), dtype=jnp.float32) * 0.05
    b_model = jnp.zeros((NUM_CLASSES,), dtype=jnp.float32)

    np_rng = np.random.default_rng(0)                  # deterministic beta sampling
    lam1 = sample_lambda_prime(np_rng, config.alpha)   # first MixUp call (labeled rows)
    lam2 = sample_lambda_prime(np_rng, config.alpha)   # second MixUp call (unlabeled rows)

    outs = mixupalg_forward(x_hat, y_one_hot, ub, (w_model, b_model), config, lam1, lam2)
    outs = jax.block_until_ready(outs)
    x_logits, x_targets, u_logits, u_targets = outs

    assert x_logits.shape == (config.batch_size, NUM_CLASSES)
    assert x_targets.shape == (config.batch_size, NUM_CLASSES)
    assert u_logits.shape == (config.k * config.batch_size, NUM_CLASSES)
    assert u_targets.shape == (config.k * config.batch_size, NUM_CLASSES)

    # Validate against the literal (mix-up + interleaved per-chunk model) reference.
    refs = mixupalg_forward_ref(x_hat, y_one_hot, ub, (w_model, b_model),
                                config, lam1, lam2)
    for got, want in zip(outs, refs):
        np.testing.assert_allclose(np.asarray(got), np.asarray(want),
                                   rtol=2e-2, atol=2e-2)

    print("KERNEL_OK")
</pallas_src>

<mosaic_0001>
module attributes {stable_mosaic.version = 11 : i64} {
  func.func @_mixmatch_kernel(%arg0: i32, %arg1: memref<8x256xbf16, #tpu.memory_space<vmem>>, %arg2: memref<2x8x256xbf16, #tpu.memory_space<vmem>>, %arg3: memref<256x128xbf16, #tpu.memory_space<vmem>>, %arg4: memref<1x128xf32, #tpu.memory_space<vmem>>, %arg5: memref<8x128xf32, #tpu.memory_space<vmem>>, %arg6: memref<2x8x128xf32, #tpu.memory_space<vmem>>, %arg7: memref<8x128xf32, #tpu.memory_space<vmem>>) attributes {dimension_semantics = [#tpu.dimension_semantics<parallel>], iteration_bounds = array<i64: 1>, scalar_prefetch = 0 : i64, scratch_operands = 0 : i64, tpu.core_type = #tpu.core_type<tc>, window_params = [{transform_indices = @transform_0, window_bounds = array<i64: 8, 256>}, {transform_indices = @transform_1, window_bounds = array<i64: 2, 8, 256>}, {pipeline_mode = #tpu.pipeline_mode<synchronous>, transform_indices = @transform_2, window_bounds = array<i64: 256, 128>}, {pipeline_mode = #tpu.pipeline_mode<synchronous>, transform_indices = @transform_3, window_bounds = array<i64: 1, 128>}, {transform_indices = @transform_4, window_bounds = array<i64: 8, 128>}, {transform_indices = @transform_5, window_bounds = array<i64: 2, 8, 128>}, {transform_indices = @transform_6, window_bounds = array<i64: 8, 128>}]} {
    %c0 = arith.constant 0 : index
    %c0_0 = arith.constant 0 : index
    %0 = vector.load %arg3[%c0, %c0_0] : memref<256x128xbf16, #tpu.memory_space<vmem>>, vector<256x128xbf16>
    %c0_1 = arith.constant 0 : index
    %c0_2 = arith.constant 0 : index
    %1 = vector.load %arg4[%c0_1, %c0_2] : memref<1x128xf32, #tpu.memory_space<vmem>>, vector<1x128xf32>
    %c0_3 = arith.constant 0 : index
    %c0_4 = arith.constant 0 : index
    %2 = vector.load %arg1[%c0_3, %c0_4] : memref<8x256xbf16, #tpu.memory_space<vmem>>, vector<8x256xbf16>
    %cst = arith.constant dense<0.000000e+00> : vector<8x128xf32>
    %3 = tpu.matmul %2, %0, %cst {dimension_numbers = #tpu.dot_dimension_numbers<[1], [0], [0], [1], [0, 0, 1, 1], [], []>} : vector<8x256xbf16>, vector<256x128xbf16>, vector<8x128xf32> -> vector<8x128xf32>
    %4 = vector.broadcast %1 : vector<1x128xf32> to vector<8x128xf32>
    %5 = arith.addf %3, %4 : vector<8x128xf32>
    %c0_5 = arith.constant 0 : index
    %c0_6 = arith.constant 0 : index
    %6 = vector.load %arg5[%c0_5, %c0_6] : memref<8x128xf32, #tpu.memory_space<vmem>>, vector<8x128xf32>
    tpu.vector_store %arg5[%c0_5, %c0_6], %5 {strides = array<i32>} : memref<8x128xf32, #tpu.memory_space<vmem>>, vector<8x128xf32>,
    %7 = tpu.iota {dimensions = array<i32: 1>} : vector<8x128xi32>
    %cst_7 = arith.constant 0.000000e+00 : f32
    %8 = vector.broadcast %cst_7 : f32 to vector<8x128xf32>
    %c0_8 = arith.constant 0 : index
    %c0_9 = arith.constant 0 : index
    %c0_10 = arith.constant 0 : index
    %9 = vector.load %arg2[%c0_8, %c0_9, %c0_10] : memref<2x8x256xbf16, #tpu.memory_space<vmem>>, vector<1x8x256xbf16>
    %10 = vector.shape_cast %9 : vector<1x8x256xbf16> to vector<8x256xbf16>
    %cst_11 = arith.constant dense<0.000000e+00> : vector<8x128xf32>
    %11 = tpu.matmul %10, %0, %cst_11 {dimension_numbers = #tpu.dot_dimension_numbers<[1], [0], [0], [1], [0, 0, 1, 1], [], []>} : vector<8x256xbf16>, vector<256x128xbf16>, vector<8x128xf32> -> vector<8x128xf32>
    %12 = vector.broadcast %1 : vector<1x128xf32> to vector<8x128xf32>
    %13 = arith.addf %11, %12 : vector<8x128xf32>
    %c0_12 = arith.constant 0 : index
    %c0_13 = arith.constant 0 : index
    %c0_14 = arith.constant 0 : index
    %14 = vector.load %arg6[%c0_12, %c0_13, %c0_14] : memref<2x8x128xf32, #tpu.memory_space<vmem>>, vector<1x8x128xf32>
    %15 = vector.shape_cast %14 : vector<1x8x128xf32> to vector<8x128xf32>
    %16 = vector.shape_cast %13 : vector<8x128xf32> to vector<1x8x128xf32>
    tpu.vector_store %arg6[%c0_12, %c0_13, %c0_14], %16 {strides = array<i32>} : memref<2x8x128xf32, #tpu.memory_space<vmem>>, vector<1x8x128xf32>,
    %c10_i32 = arith.constant 10 : i32
    %17 = vector.broadcast %c10_i32 : i32 to vector<8x128xi32>
    %18 = arith.cmpi slt, %7, %17 : vector<8x128xi32>
    %cst_15 = arith.constant -1.000000e+30 : f32
    %19 = vector.broadcast %cst_15 : f32 to vector<8x128xf32>
    %20 = arith.select %18, %13, %19 : vector<8x128xi1>, vector<8x128xf32>
    %cst_16 = arith.constant dense<0xFF800000> : vector<8xf32>
    %21 = vector.multi_reduction <maximumf>, %20, %cst_16 [1] : vector<8x128xf32> to vector<8xf32>
    %22 = vector.shape_cast %21 : vector<8xf32> to vector<8x1xf32>
    %23 = vector.broadcast %22 : vector<8x1xf32> to vector<8x128xf32>
    %24 = arith.subf %20, %23 : vector<8x128xf32>
    %25 = math.exp %24 : vector<8x128xf32>
    %cst_17 = arith.constant dense<0.000000e+00> : vector<8xf32>
    %26 = vector.multi_reduction <add>, %25, %cst_17 [1] : vector<8x128xf32> to vector<8xf32>
    %27 = vector.shape_cast %26 : vector<8xf32> to vector<8x1xf32>
    %28 = tpu.reciprocal %27 {approx = true} : vector<8x1xf32> -> vector<8x1xf32>
    %29 = vector.broadcast %28 : vector<8x1xf32> to vector<8x128xf32>
    %30 = arith.mulf %25, %29 : vector<8x128xf32>
    %31 = arith.addf %8, %30 : vector<8x128xf32>
    %c1 = arith.constant 1 : index
    %c0_18 = arith.constant 0 : index
    %c0_19 = arith.constant 0 : index
    %32 = vector.load %arg2[%c1, %c0_18, %c0_19] : memref<2x8x256xbf16, #tpu.memory_space<vmem>>, vector<1x8x256xbf16>
    %33 = vector.shape_cast %32 : vector<1x8x256xbf16> to vector<8x256xbf16>
    %cst_20 = arith.constant dense<0.000000e+00> : vector<8x128xf32>
    %34 = tpu.matmul %33, %0, %cst_20 {dimension_numbers = #tpu.dot_dimension_numbers<[1], [0], [0], [1], [0, 0, 1, 1], [], []>} : vector<8x256xbf16>, vector<256x128xbf16>, vector<8x128xf32> -> vector<8x128xf32>
    %35 = vector.broadcast %1 : vector<1x128xf32> to vector<8x128xf32>
    %36 = arith.addf %34, %35 : vector<8x128xf32>
    %c1_21 = arith.constant 1 : index
    %c0_22 = arith.constant 0 : index
    %c0_23 = arith.constant 0 : index
    %37 = vector.load %arg6[%c1_21, %c0_22, %c0_23] : memref<2x8x128xf32, #tpu.memory_space<vmem>>, vector<1x8x128xf32>
    %38 = vector.shape_cast %37 : vector<1x8x128xf32> to vector<8x128xf32>
    %39 = vector.shape_cast %36 : vector<8x128xf32> to vector<1x8x128xf32>
    tpu.vector_store %arg6[%c1_21, %c0_22, %c0_23], %39 {strides = array<i32>} : memref<2x8x128xf32, #tpu.memory_space<vmem>>, vector<1x8x128xf32>,
    %c10_i32_24 = arith.constant 10 : i32
    %40 = vector.broadcast %c10_i32_24 : i32 to vector<8x128xi32>
    %41 = arith.cmpi slt, %7, %40 : vector<8x128xi32>
    %cst_25 = arith.constant -1.000000e+30 : f32
    %42 = vector.broadcast %cst_25 : f32 to vector<8x128xf32>
    %43 = arith.select %41, %36, %42 : vector<8x128xi1>, vector<8x128xf32>
    %cst_26 = arith.constant dense<0xFF800000> : vector<8xf32>
    %44 = vector.multi_reduction <maximumf>, %43, %cst_26 [1] : vector<8x128xf32> to vector<8xf32>
    %45 = vector.shape_cast %44 : vector<8xf32> to vector<8x1xf32>
    %46 = vector.broadcast %45 : vector<8x1xf32> to vector<8x128xf32>
    %47 = arith.subf %43, %46 : vector<8x128xf32>
    %48 = math.exp %47 : vector<8x128xf32>
    %cst_27 = arith.constant dense<0.000000e+00> : vector<8xf32>
    %49 = vector.multi_reduction <add>, %48, %cst_27 [1] : vector<8x128xf32> to vector<8xf32>
    %50 = vector.shape_cast %49 : vector<8xf32> to vector<8x1xf32>
    %51 = tpu.reciprocal %50 {approx = true} : vector<8x1xf32> -> vector<8x1xf32>
    %52 = vector.broadcast %51 : vector<8x1xf32> to vector<8x128xf32>
    %53 = arith.mulf %48, %52 : vector<8x128xf32>
    %54 = arith.addf %31, %53 : vector<8x128xf32>
    %cst_28 = arith.constant 5.000000e-01 : f32
    %55 = vector.broadcast %cst_28 : f32 to vector<8x128xf32>
    %56 = arith.mulf %54, %55 : vector<8x128xf32>
    %c0_29 = arith.constant 0 : index
    %c0_30 = arith.constant 0 : index
    %57 = vector.load %arg7[%c0_29, %c0_30] : memref<8x128xf32, #tpu.memory_space<vmem>>, vector<8x128xf32>
    tpu.vector_store %arg7[%c0_29, %c0_30], %56 {strides = array<i32>} : memref<8x128xf32, #tpu.memory_space<vmem>>, vector<8x128xf32>,
    return
  }
  func.func @transform_0(%arg0: i32) -> (i32, i32) {
    %c0_i32 = arith.constant 0 : i32
    %c0_i32_0 = arith.constant 0 : i32
    return %arg0, %c0_i32 : i32, i32
  }
  func.func @transform_1(%arg0: i32) -> (i32, i32, i32) {
    %c0_i32 = arith.constant 0 : i32
    %c0_i32_0 = arith.constant 0 : i32
    %c0_i32_1 = arith.constant 0 : i32
    return %c0_i32, %arg0, %c0_i32_0 : i32, i32, i32
  }
  func.func @transform_2(%arg0: i32) -> (i32, i32) {
    %c0_i32 = arith.constant 0 : i32
    %c0_i32_0 = arith.constant 0 : i32
    %c0_i32_1 = arith.constant 0 : i32
    return %c0_i32, %c0_i32_0 : i32, i32
  }
  func.func @transform_3(%arg0: i32) -> (i32, i32) {
    %c0_i32 = arith.constant 0 : i32
    %c0_i32_0 = arith.constant 0 : i32
    %c0_i32_1 = arith.constant 0 : i32
    return %c0_i32, %c0_i32_0 : i32, i32
  }
  func.func @transform_4(%arg0: i32) -> (i32, i32) {
    %c0_i32 = arith.constant 0 : i32
    %c0_i32_0 = arith.constant 0 : i32
    return %arg0, %c0_i32 : i32, i32
  }
  func.func @transform_5(%arg0: i32) -> (i32, i32, i32) {
    %c0_i32 = arith.constant 0 : i32
    %c0_i32_0 = arith.constant 0 : i32
    %c0_i32_1 = arith.constant 0 : i32
    return %c0_i32, %arg0, %c0_i32_0 : i32, i32, i32
  }
  func.func @transform_6(%arg0: i32) -> (i32, i32) {
    %c0_i32 = arith.constant 0 : i32
    %c0_i32_0 = arith.constant 0 : i32
    return %arg0, %c0_i32 : i32, i32
  }
}

</mosaic_0001>

<bundles_post_ra>
// kernel: tpu_custom_call.1
= control target key start
LH: loop header
LB: loop body
LE: loop exit
PB: predicated region body
PF: predicated region fallthrough
CT: control target
= control target key end

     0   :  { %12 = vsyncpa [#allocation3], 0  ;;  %s749_s0 = inlined_call_operand.hbm [shape: bf16[8,256], index: 0, kind: input, shape index: {}]   ;;  %s750_s1 = inlined_call_operand.hbm [shape: bf16[2,8,256], index: 1, kind: input, shape index: {}]   ;;  %s751_s2 = inlined_call_operand.hbm [shape: bf16[256,128], index: 2, kind: input, shape index: {}]   ;;  %s752_s3 = inlined_call_operand.vmem [shape: f32[1,128], index: 3, kind: input, shape index: {}]   ;;  %s753_s4 = inlined_call_operand.hbm [shape: f32[8,128], index: 4, kind: output, shape index: {0}]   ;;  %s754_s5 = inlined_call_operand.hbm [shape: f32[2,8,128], index: 5, kind: output, shape index: {1}]   ;;  %s755_s6 = inlined_call_operand.hbm [shape: f32[8,128], index: 6, kind: output, shape index: {2}]  }
   0x1   :  { %13 = vsyncpa [#allocation6], 0 }
   0x2   :  { %14 = vsyncpa [#allocation4], 0 }
   0x3   :  { %15 = vsyncpa [#allocation10], 0  ;;  %s675_s21 = smov [#allocation5]  }
   0x4   :  { %s31_s22 = sshll.u32 %s675_s21, 4  ;;  %s32_s22 = int_to_ptr.vmem [resolvable:$true] %s31_s22 }
   0x5   :  { %s555_s23 = scalar_lea.vmem %s32_s22, 256  ;;  %p560_p1 = scmp.lt.s32.totalorder %s32_s22, %s32_s22 }
   0x6   :  { %p556_p0 = scmp.ne.s32.totalorder %s32_s22, %s555_s23  ;;  %p561_p2 = scmp.lt.s32.totalorder %s555_s23, %s555_s23 }
   0x8   :  { %p562_p3 = por %p561_p2, %p560_p1 }
   0xa   :  { %p563_p4 = pnand %p562_p3, %p556_p0 }
   0xc   :  { %566 = shalt.err (!%p563_p4)
}
   0xd   :  { %s676_s24 = smov 128   ;;  %s677_s25 = smov 8  }
   0xe   :  { %37 = dma.hbm_to_vmem [thread:$0]  %s750_s1, 256, %s32_s22, [#allocation6], %s676_s24, %s676_s24, %s677_s25  }
   0xf   :  { %s678_s28 = smov [#allocation2]   ;;  %s679_s30 = smov [#allocation7]  }
  0x10   :  { %s22_s29 = sshll.u32 %s678_s28, 4  ;;  %s43_s7 = sshll.u32 %s679_s30, 4  ;;  %s23_s29 = int_to_ptr.vmem [resolvable:$true] %s22_s29  ;;  %s44_s7 = int_to_ptr.vmem [resolvable:$true] %s43_s7 }
  0x11   :  { %s575_s8 = scalar_lea.vmem %s23_s29, 128  ;;  %p580_p6 = scmp.lt.s32.totalorder %s23_s29, %s23_s29 }
  0x12   :  { %p576_p5 = scmp.ne.s32.totalorder %s23_s29, %s575_s8  ;;  %p581_p7 = scmp.lt.s32.totalorder %s575_s8, %s575_s8 }
  0x14   :  { %p582_p8 = por %p581_p7, %p580_p6 }
  0x16   :  { %p583_p9 = pnand %p582_p8, %p576_p5 }
  0x18   :  { %586 = shalt.err (!%p583_p9)
}
  0x19   :  { %25 = dma.hbm_to_vmem [thread:$0]  %s749_s0, 128, %s23_s29, [#allocation3]  }
  0x1a   :  { %s595_s11 = scalar_lea.vmem %s44_s7, 2048  ;;  %p600_p11 = scmp.lt.s32.totalorder %s44_s7, %s44_s7 }
  0x1b   :  { %p596_p10 = scmp.ne.s32.totalorder %s44_s7, %s595_s11  ;;  %p601_p12 = scmp.lt.s32.totalorder %s595_s11, %s595_s11 }
  0x1d   :  { %p602_p13 = por %p601_p12, %p600_p11 }
  0x1f   :  { %p603_p0 = pnand %p602_p13, %p596_p10 }
  0x21   :  { %606 = shalt.err (!%p603_p0)
}
  0x22   :  { %s680_s1 = smov 64   ;;  %s681_s12 = smov 4  }
  0x23   :  { %49 = dma.hbm_to_vmem [thread:$0]  %s751_s2, 2048, %s44_s7, [#allocation6], %s680_s1, %s680_s1, %s681_s12  }
  0x24   :  { %667 = dma.done.wait [#allocation3], 128  }
  0x25   :  { %668 = vsyncadd [#allocation3], 4294967168 }
  0x26   :  { %669 = dma.done.wait [#allocation6], 2304  }
  0x27   :  { %670 = vsyncadd [#allocation6], 4294964992  ;;  %v517_v0 = vld [vmem:[#allocation7 + $0x78] sm:$0xff]   ;;  %v519_v2 = vld [vmem:[#allocation7 + $0x70] sm:$0xff]   ;;  %v246_v25 = vlaneseq  ;;  %s683_s16 = smov [#allocation8]  }
  0x28   :  { %v518_v1 = vld [vmem:[#allocation7 + $0x38] sm:$0xff]   ;;  %441 = vmatprep.subr.bf16.mxu0 %v517_v0  ;;  %463 = vmatprep.subr.bf16.mxu1 %v517_v0  ;;  %v520_v3 = vld [vmem:[#allocation7 + $0x30] sm:$0xff]   ;;  %v521_v4 = vld [vmem:[#allocation7 + $0x68] sm:$0xff]   ;;  %s379_s17 = sshll.u32 %s683_s16, 4  ;;  %s380_s17 = int_to_ptr.vmem [resolvable:$true] %s379_s17 }
  0x29   :  { %442 = vmatpush3.bf16.msra.mxu0 %v518_v1  ;;  %464 = vmatpush3.bf16.msra.mxu1 %v518_v1  ;;  %v522_v5 = vld [vmem:[#allocation7 + $0x28] sm:$0xff]   ;;  %v523_v6 = vld [vmem:[#allocation7 + $0x60] sm:$0xff]   ;;  %v525_v8 = vld [vmem:[#allocation7 + $0x58] sm:$0xff]   ;;  %v247_v28 = vand.u32 127, %v246_v25 }
  0x2a   :  { %443 = vmatprep.subr.bf16.mxu0 %v519_v2  ;;  %465 = vmatprep.subr.bf16.mxu1 %v519_v2  ;;  %v524_v7 = vld [vmem:[#allocation7 + $0x20] sm:$0xff]   ;;  %v526_v9 = vld [vmem:[#allocation7 + $0x18] sm:$0xff]   ;;  %v527_v10 = vld [vmem:[#allocation7 + $0x50] sm:$0xff]  }
  0x2b   :  { %v95_v11 = vld [vmem:[#allocation2] sm:$0xff]  ;;  %v248_v12 = vld [vmem:[#allocation5] sm:$0xff]  ;;  %v531_v18 = vld [vmem:[#allocation7 + $0x40] sm:$0xff]   ;;  %vm297_vm0 = vcmp.lt.s32.totalorder %v247_v28, 10 }
  0x2c   :  { %v420_v13 = vcombine.high %v95_v11, %v95_v11  ;;  %v438_v14 = vcombine.high %v248_v12, %v248_v12  ;;  %v528_v15 = vld [vmem:[#allocation7 + $0x10] sm:$0xff]   ;;  %v529_v16 = vld [vmem:[#allocation7 + $0x48] sm:$0xff]   ;;  %v532_v19 = vld [vmem:[#allocation7] sm:$0xff]   ;;  %v419_v21 = vcombine.low %v95_v11, %v95_v11  ;;  %v437_v22 = vcombine.low %v248_v12, %v248_v12 }
  0x2d   :  { %444 = vmatpush3.bf16.msra.mxu0 %v520_v3  ;;  %466 = vmatpush3.bf16.msra.mxu1 %v520_v3  ;;  %v530_v17 = vld [vmem:[#allocation7 + $0x8] sm:$0xff]   ;;  %v310_v20 = vld [vmem:[#allocation5 + $0x8] sm:$0xff] }
  0x2e   :  { %445 = vmatprep.subr.bf16.mxu0 %v521_v4  ;;  %467 = vmatprep.subr.bf16.mxu1 %v521_v4  ;;  %v440_v23 = vcombine.high %v310_v20, %v310_v20  ;;  %v439_v24 = vcombine.low %v310_v20, %v310_v20  ;;  %v418_v29 = vld [vmem:[%s752_s3] ss:$0 sm:$0xff]  ;;  %s682_s3 = smov [#allocation9]  }
  0x2f   :  { %237 = vmatprep.mubr.bf16.mxu0 %v420_v13  ;;  %288 = vmatprep.mubr.bf16.mxu1 %v438_v14  ;;  %s388_s15 = sshll.u32 %s682_s3, 4  ;;  %s389_s15 = int_to_ptr.vmem [resolvable:$true] %s388_s15 }
  0x30   :  { %s607_s18 = scalar_lea.vmem %s389_s15, 256  ;;  %p612_p2 = scmp.lt.s32.totalorder %s389_s15, %s389_s15 }
  0x31   :  { %446 = vmatpush3.bf16.msra.mxu0 %v522_v5  ;;  %468 = vmatpush3.bf16.msra.mxu1 %v522_v5  ;;  %p608_p1 = scmp.ne.s32.totalorder %s389_s15, %s607_s18  ;;  %p613_p3 = scmp.lt.s32.totalorder %s607_s18, %s607_s18 }
  0x32   :  { %447 = vmatprep.subr.bf16.mxu0 %v523_v6  ;;  %469 = vmatprep.subr.bf16.mxu1 %v523_v6 }
  0x33   :  { %p614_p4 = por %p613_p3, %p612_p2 }
  0x35   :  { %448 = vmatpush3.bf16.msra.mxu0 %v524_v7  ;;  %470 = vmatpush3.bf16.msra.mxu1 %v524_v7  ;;  %p615_p5 = pnand %p614_p4, %p608_p1 }
  0x36   :  { %449 = vmatprep.subr.bf16.mxu0 %v525_v8  ;;  %471 = vmatprep.subr.bf16.mxu1 %v525_v8 }
  0x39   :  { %450 = vmatpush3.bf16.msra.mxu0 %v526_v9  ;;  %472 = vmatpush3.bf16.msra.mxu1 %v526_v9 }
  0x3a   :  { %451 = vmatprep.subr.bf16.mxu0 %v527_v10  ;;  %473 = vmatprep.subr.bf16.mxu1 %v527_v10 }
  0x3d   :  { %452 = vmatpush3.bf16.msra.mxu0 %v528_v15  ;;  %474 = vmatpush3.bf16.msra.mxu1 %v528_v15 }
  0x3e   :  { %453 = vmatprep.subr.bf16.mxu0 %v529_v16  ;;  %475 = vmatprep.subr.bf16.mxu1 %v529_v16 }
  0x41   :  { %454 = vmatpush3.bf16.msra.mxu0 %v530_v17  ;;  %476 = vmatpush3.bf16.msra.mxu1 %v530_v17 }
  0x42   :  { %455 = vmatprep.subr.bf16.mxu0 %v531_v18  ;;  %477 = vmatprep.subr.bf16.mxu1 %v531_v18 }
  0x45   :  { %456 = vmatpush3.bf16.msra.mxu0 %v532_v19  ;;  %478 = vmatpush3.bf16.msra.mxu1 %v532_v19 }
  0x46   :  { %485 = vmatprep.subr.bf16.mxu0 %v517_v0 }
  0x48   :  { %238 = vmatmul.mubr.bf16.vlgmr.msra.gmra.mxu0 %v419_v21  ;;  %289 = vmatmul.mubr.bf16.vlgmr.msra.gmra.mxu1 %v437_v22 }
  0x49   :  { %486 = vmatpush3.bf16.msra.mxu0 %v518_v1  ;;  %350 = vmatprep.mubr.bf16.mxu0 %v440_v23 }
  0x4a   :  { %487 = vmatprep.subr.bf16.mxu0 %v519_v2 }
  0x4d   :  { %488 = vmatpush3.bf16.msra.mxu0 %v520_v3 }
  0x4e   :  { %489 = vmatprep.subr.bf16.mxu0 %v521_v4 }
  0x51   :  { %490 = vmatpush3.bf16.msra.mxu0 %v522_v5 }
  0x52   :  { %491 = vmatprep.subr.bf16.mxu0 %v523_v6 }
  0x55   :  { %492 = vmatpush3.bf16.msra.mxu0 %v524_v7 }
  0x56   :  { %493 = vmatprep.subr.bf16.mxu0 %v525_v8 }
  0x59   :  { %494 = vmatpush3.bf16.msra.mxu0 %v526_v9 }
  0x5a   :  { %495 = vmatprep.subr.bf16.mxu0 %v527_v10 }
  0x5d   :  { %496 = vmatpush3.bf16.msra.mxu0 %v528_v15 }
  0x5e   :  { %497 = vmatprep.subr.bf16.mxu0 %v529_v16 }
  0x61   :  { %498 = vmatpush3.bf16.msra.mxu0 %v530_v17 }
  0x62   :  { %499 = vmatprep.subr.bf16.mxu0 %v531_v18 }
  0x65   :  { %500 = vmatpush3.bf16.msra.mxu0 %v532_v19 }
  0x68   :  { %351 = vmatmul.mubr.bf16.vlgmr.msra.gmra.mxu0 %v439_v24 }
 0x108   :  { %v457_v26 = vpop.f32.mrf.mxu0  ;;  %v479_v27 = vpop.f32.mrf.mxu1 }
 0x10a   :  { %v458_v30 = vpop.f32.mrf.mxu0  ;;  %v480_v31 = vpop.f32.mrf.mxu1 }
 0x10b   :  { %v459_v32 = vadd.f32 %v458_v30, %v457_v26  ;;  %v481_v33 = vadd.f32 %v480_v31, %v479_v27 }
 0x10c   :  { %v460_v34 = vpop.f32.mrf.mxu0  ;;  %v482_v35 = vpop.f32.mrf.mxu1 }
 0x10d   :  { %v240_v36 = vadd.f32 %v459_v32, %v418_v29  ;;  %v291_v37 = vadd.f32 %v481_v33, %v418_v29 }
 0x10e   :  { %v461_v38 = vpop.f32.mrf.mxu0  ;;  %v483_v39 = vpop.f32.mrf.mxu1 }
 0x10f   :  { %245 = vst [vmem:[#allocation8] sm:$0xff] %v240_v36  ;;  %v298_v40 = vsel %vm297_vm0, %v291_v37, -1e+30  ;;  %296 = vst [vmem:[#allocation9] sm:$0xff] %v291_v37 }
 0x110   :  { %299 = vmax.xlane.f32.xlu0 %v298_v40 }
 0x128   :  { %v501_v41 = vpop.f32.mrf.mxu0 }
 0x12a   :  { %v502_v42 = vpop.f32.mrf.mxu0 }
 0x12b   :  { %v503_v43 = vadd.f32 %v502_v42, %v501_v41 }
 0x12c   :  { %v504_v44 = vpop.f32.mrf.mxu0 }
 0x12d   :  { %v353_v45 = vadd.f32 %v503_v43, %v418_v29 }
 0x12e   :  { %v505_v46 = vpop.f32.mrf.mxu0 }
 0x12f   :  { %v360_v47 = vsel %vm297_vm0, %v353_v45, -1e+30  ;;  %359 = vst [vmem:[#allocation9 + $0x8] sm:$0xff] %v353_v45 }
 0x130   :  { %361 = vmax.xlane.f32.xlu0 %v360_v47 }
 0x199   :  { %v300_v48 = vpop.xlane.xlu0 %299 }
 0x19a   :  { %v301_v49 = vsub.f32 %v298_v40, %v300_v48 }
 0x19c   :  { %v302_v50 = vmul.f32 1.442695, %v301_v49 }
 0x19e   :  { %539 = vpow2.f32 %v302_v50 }
 0x1ab   :  { %v540_v51 = vpop.eup %539 }
 0x1ac   :  { %304 = vadd.xlane.f32.xlu1 %v540_v51 }
 0x1b9   :  { %v362_v52 = vpop.xlane.xlu0 %361 }
 0x1ba   :  { %v363_v53 = vsub.f32 %v360_v47, %v362_v52 }
 0x1bc   :  { %v364_v54 = vmul.f32 1.442695, %v363_v53 }
 0x1be   :  { %541 = vpow2.f32 %v364_v54 }
 0x1cb   :  { %v542_v55 = vpop.eup %541 }
 0x1cc   :  { %366 = vadd.xlane.f32.xlu1 %v542_v55 }
 0x1cd   :  { %618 = shalt.err (!%p615_p5)
}
 0x1ce   :  { %394 = dma.vmem_to_hbm [thread:$0]  %s389_s15, 256, %s754_s5, [#allocation10], %s676_s24, %s676_s24, %s677_s25  }
 0x1cf   :  { %s627_s21 = scalar_lea.vmem %s380_s17, 128  ;;  %p632_p7 = scmp.lt.s32.totalorder %s380_s17, %s380_s17 }
 0x1d0   :  { %p628_p6 = scmp.ne.s32.totalorder %s380_s17, %s627_s21  ;;  %p633_p8 = scmp.lt.s32.totalorder %s627_s21, %s627_s21 }
 0x1d2   :  { %p634_p9 = por %p633_p8, %p632_p7 }
 0x1d4   :  { %p635_p10 = pnand %p634_p9, %p628_p6 }
 0x1d6   :  { %638 = shalt.err (!%p635_p10)
}
 0x1d7   :  { %382 = dma.vmem_to_hbm [thread:$0]  %s380_s17, 128, %s753_s4, [#allocation4]  }
 0x1d8   :  { %s684_s5 = smov [#allocation11]  }
 0x1d9   :  { %s401_s24 = sshll.u32 %s684_s5, 4  ;;  %s402_s24 = int_to_ptr.vmem [resolvable:$true] %s401_s24 }
 0x1da   :  { %s647_s25 = scalar_lea.vmem %s402_s24, 128  ;;  %p652_p12 = scmp.lt.s32.totalorder %s402_s24, %s402_s24 }
 0x1db   :  { %p648_p11 = scmp.ne.s32.totalorder %s402_s24, %s647_s25  ;;  %p653_p13 = scmp.lt.s32.totalorder %s647_s25, %s647_s25 }
 0x1dd   :  { %p654_p0 = por %p653_p13, %p652_p12 }
 0x1df   :  { %p655_p1 = pnand %p654_p0, %p648_p11 }
 0x235   :  { %v305_v56 = vpop.xlane.xlu1 %304 }
 0x236   :  { %543 = vrcp.f32 %v305_v56 }
 0x243   :  { %v544_v58 = vpop.eup %543 }
 0x244   :  { %v307_v60 = vmul.f32 %v544_v58, %v540_v51 }
 0x255   :  { %v367_v57 = vpop.xlane.xlu1 %366 }
 0x256   :  { %545 = vrcp.f32 %v367_v57 }
 0x263   :  { %v546_v59 = vpop.eup %545 }
 0x264   :  { %v369_v61 = vmul.f32 %v546_v59, %v542_v55 }
 0x266   :  { %v370_v62 = vadd.f32 %v369_v61, %v307_v60 }
 0x268   :  { %v371_v63 = vmul.f32 0.5, %v370_v62 }
 0x26a   :  { %372 = vst [vmem:[#allocation11] sm:$0xff] %v371_v63 }
 0x26b   :  { %658 = shalt.err (!%p655_p1)
}
 0x26c   :  { %404 = dma.vmem_to_hbm [thread:$0]  %s402_s24, 128, %s755_s6, [#allocation10]  }
 0x26d   :  { %671 = dma.done.wait [#allocation4], 128  }
 0x26e   :  { %672 = vsyncadd [#allocation4], 4294967168 }
 0x26f   :  { %673 = dma.done.wait [#allocation10], 384  }
 0x270   :  { %674 = vsyncadd [#allocation10], 4294966912 }
 0x271   :  { %414 = vsyncpa [#allocation3], 1 }
 0x272   :  { %415 = vsyncpa [#allocation6], 1 }
 0x273   :  { %416 = vsyncpa [#allocation4], 1 }
 0x274   :  { %417 = vsyncpa [#allocation10], 1 }

</bundles_post_ra>
